<compile_context>
chip_gen: v6e
topology: v6e:2x2x1
jax: 0.10.0
libtpu: 0.0.40
codegen_flags: <defaults>
</compile_context>

<pallas_src>
import math

import jax
import jax.numpy as jnp
from jax.experimental import pallas as pl
from jax.experimental.pallas import tpu as pltpu

# WingLoss constants (w=10, e=2); LandmarksLoss alpha=1.0 (unused in forward math).
_W = 10.0
_E = 2.0
_INV_E = 1.0 / _E
_C = _W - _W * math.log(1.0 + _W / _E)

_LANES = 128            # vreg lane width
_MAX_BLOCK_ROWS = 2048  # 2048 * 128 * 4B = 1 MiB per input per pipeline buffer


def _landmarks_loss_kernel(pred_ref, true_ref, mask_ref, out_ref, acc_ref):
    i = pl.program_id(0)

    @pl.when(i == 0)
    def _init():
        acc_ref[0] = jnp.float32(0.0)  # running sum of WingLoss y
        acc_ref[1] = jnp.float32(0.0)  # running sum of mask

    # Widen once on load (no-op if inputs already f32); all math stays in f32.
    pred = pred_ref[...].astype(jnp.float32)
    t    = true_ref[...].astype(jnp.float32)
    m    = mask_ref[...].astype(jnp.float32)

    # LandmarksLoss: x = pred * mask, target = truel * mask
    x  = pred * m
    tm = t * m

    # WingLoss with select-based branching (weight / flag folded into vsel).
    diff     = jnp.where(tm == -1.0, 0.0, x - tm)
    abs_diff = jnp.abs(diff)
    y = jnp.where(abs_diff < _W,
                  _W * jnp.log(1.0 + abs_diff * _INV_E),
                  abs_diff - _C)

    # Zero-padded tail rows contribute exactly 0 to both sums.
    acc_ref[0] += jnp.sum(y)
    acc_ref[1] += jnp.sum(m)

    @pl.when(i == pl.num_programs(0) - 1)
    def _finalize():
        out_ref[0, 0] = acc_ref[0] / (acc_ref[1] + 1e-13)


def landmarks_loss(pred, truel, mask):
    """pred, truel, mask: equal-shaped float arrays. Returns scalar f32 loss."""
    assert pred.shape == truel.shape == mask.shape
    total = math.prod(pred.shape)

    # Lane-dense repack: flatten, zero-pad, reshape to (rows, 128).
    rows = pl.cdiv(total, _LANES)
    if rows <= _MAX_BLOCK_ROWS:
        block_rows = max(8, pl.cdiv(rows, 8) * 8)   # single tile, (8,128)-aligned
    else:
        block_rows = _MAX_BLOCK_ROWS
    padded_rows = pl.cdiv(rows, block_rows) * block_rows
    padded_total = padded_rows * _LANES

    def pack(a):
        a = a.reshape(-1)
        pad = padded_total - total
        if pad:
            a = jnp.pad(a, (0, pad))
        return a.reshape(padded_rows, _LANES)

    grid = (padded_rows // block_rows,)
    block_spec = pl.BlockSpec((block_rows, _LANES), lambda i: (i, 0))

    out = pl.pallas_call(
        _landmarks_loss_kernel,
        out_shape=jax.ShapeDtypeStruct((1, 1), jnp.float32),
        grid=grid,
        in_specs=[block_spec, block_spec, block_spec],
        out_specs=pl.BlockSpec(memory_space=pltpu.SMEM),
        scratch_shapes=[pltpu.SMEM((2,), jnp.float32)],
        compiler_params=pltpu.CompilerParams(
            dimension_semantics=("arbitrary",),   # axis carries the accumulator
            vmem_limit_bytes=32 * 1024 * 1024,
        ),
    )(pack(pred), pack(truel), pack(mask))
    return out[0, 0]


def _reference(pred, truel, mask):
    # Pure-JAX reference mirroring the PyTorch module exactly.
    x = pred * mask
    t = truel * mask
    weight = jnp.where(t == -1.0, 0.0, 1.0)
    diff = weight * (x - t)
    abs_diff = jnp.abs(diff)
    flag = (abs_diff < _W).astype(jnp.float32)
    y = flag * _W * jnp.log(1.0 + abs_diff / _E) + (1.0 - flag) * (abs_diff - _C)
    return jnp.sum(y) / (jnp.sum(mask) + 1e-13)


if __name__ == "__main__":
    key = jax.random.PRNGKey(0)

    def make_inputs(k, n, d):
        k1, k2, k3, k4 = jax.random.split(k, 4)
        pred = jax.random.normal(k1, (n, d), dtype=jnp.float32) * 5.0
        truel = jax.random.uniform(k2, (n, d), dtype=jnp.float32) * 16.0
        ignore = jax.random.bernoulli(k3, 0.2, (n, d))
        truel = jnp.where(ignore, -1.0, truel)   # ignored landmarks
        mask = jax.random.bernoulli(k4, 0.7, (n, d)).astype(jnp.float32)
        return pred, truel, mask

    k_small, k_big = jax.random.split(key)

    # Small shape consistent with landmark regression: 32 anchors x (5 lm * 2 coords).
    pred, truel, mask = make_inputs(k_small, 32, 10)
    out = landmarks_loss(pred, truel, mask)
    jax.block_until_ready(out)
    ref = _reference(pred, truel, mask)
    assert jnp.allclose(out, ref, rtol=1e-5, atol=1e-5), (out, ref)

    # Larger case to exercise the multi-tile accumulator path (grid > 1).
    pred, truel, mask = make_inputs(k_big, 30000, 10)
    out = landmarks_loss(pred, truel, mask)
    jax.block_until_ready(out)
    ref = _reference(pred, truel, mask)
    assert jnp.allclose(out, ref, rtol=1e-4, atol=1e-4), (out, ref)

    print("KERNEL_OK")
</pallas_src>

<mosaic_0001>
module attributes {stable_mosaic.version = 11 : i64} {
  func.func @_landmarks_loss_kernel(%arg0: i32, %arg1: memref<8x128xf32, #tpu.memory_space<vmem>>, %arg2: memref<8x128xf32, #tpu.memory_space<vmem>>, %arg3: memref<8x128xf32, #tpu.memory_space<vmem>>, %arg4: memref<1x1xf32, #tpu.memory_space<smem>>, %arg5: memref<2xf32, #tpu.memory_space<smem>>) attributes {dimension_semantics = [#tpu.dimension_semantics<arbitrary>], iteration_bounds = array<i64: 1>, scalar_prefetch = 0 : i64, scratch_operands = 1 : i64, tpu.core_type = #tpu.core_type<tc>, window_params = [{transform_indices = @transform_0, window_bounds = array<i64: 8, 128>}, {transform_indices = @transform_1, window_bounds = array<i64: 8, 128>}, {transform_indices = @transform_2, window_bounds = array<i64: 8, 128>}, {transform_indices = @transform_3, window_bounds = array<i64: 1, 1>}]} {
    %c0_i32 = arith.constant 0 : i32
    %0 = arith.cmpi eq, %arg0, %c0_i32 : i32
    %1 = arith.extui %0 : i1 to i32
    %c0_i32_0 = arith.constant 0 : i32
    %2 = arith.cmpi ne, %1, %c0_i32_0 : i32
    scf.if %2 {
      %cst_19 = arith.constant 0.000000e+00 : f32
      %c0_20 = arith.constant 0 : index
      %43 = memref.load %arg5[%c0_20] : memref<2xf32, #tpu.memory_space<smem>>
      memref.store %cst_19, %arg5[%c0_20] : memref<2xf32, #tpu.memory_space<smem>>
      %cst_21 = arith.constant 0.000000e+00 : f32
      %c1_22 = arith.constant 1 : index
      %44 = memref.load %arg5[%c1_22] : memref<2xf32, #tpu.memory_space<smem>>
      memref.store %cst_21, %arg5[%c1_22] : memref<2xf32, #tpu.memory_space<smem>>
    } else {
    }
    %c0 = arith.constant 0 : index
    %c0_1 = arith.constant 0 : index
    %3 = vector.load %arg1[%c0, %c0_1] : memref<8x128xf32, #tpu.memory_space<vmem>>, vector<8x128xf32>
    %c0_2 = arith.constant 0 : index
    %c0_3 = arith.constant 0 : index
    %4 = vector.load %arg2[%c0_2, %c0_3] : memref<8x128xf32, #tpu.memory_space<vmem>>, vector<8x128xf32>
    %c0_4 = arith.constant 0 : index
    %c0_5 = arith.constant 0 : index
    %5 = vector.load %arg3[%c0_4, %c0_5] : memref<8x128xf32, #tpu.memory_space<vmem>>, vector<8x128xf32>
    %6 = arith.mulf %3, %5 : vector<8x128xf32>
    %7 = arith.mulf %4, %5 : vector<8x128xf32>
    %cst = arith.constant -1.000000e+00 : f32
    %8 = vector.broadcast %cst : f32 to vector<8x128xf32>
    %9 = arith.cmpf oeq, %7, %8 : vector<8x128xf32>
    %10 = arith.subf %6, %7 : vector<8x128xf32>
    %cst_6 = arith.constant 0.000000e+00 : f32
    %11 = vector.broadcast %cst_6 : f32 to vector<8x128xf32>
    %12 = arith.select %9, %11, %10 : vector<8x128xi1>, vector<8x128xf32>
    %13 = math.absf %12 : vector<8x128xf32>
    %cst_7 = arith.constant 1.000000e+01 : f32
    %14 = vector.broadcast %cst_7 : f32 to vector<8x128xf32>
    %15 = arith.cmpf olt, %13, %14 : vector<8x128xf32>
    %cst_8 = arith.constant 5.000000e-01 : f32
    %16 = vector.broadcast %cst_8 : f32 to vector<8x128xf32>
    %17 = arith.mulf %13, %16 : vector<8x128xf32>
    %cst_9 = arith.constant 1.000000e+00 : f32
    %18 = vector.broadcast %cst_9 : f32 to vector<8x128xf32>
    %19 = arith.addf %18, %17 : vector<8x128xf32>
    %20 = math.log %19 : vector<8x128xf32>
    %cst_10 = arith.constant 1.000000e+01 : f32
    %21 = vector.broadcast %cst_10 : f32 to vector<8x128xf32>
    %22 = arith.mulf %21, %20 : vector<8x128xf32>
    %cst_11 = arith.constant -7.9175949 : f32
    %23 = vector.broadcast %cst_11 : f32 to vector<8x128xf32>
    %24 = arith.subf %13, %23 : vector<8x128xf32>
    %25 = arith.select %15, %22, %24 : vector<8x128xi1>, vector<8x128xf32>
    %c0_12 = arith.constant 0 : index
    %26 = memref.load %arg5[%c0_12] : memref<2xf32, #tpu.memory_space<smem>>
    %27 = vector.shape_cast %25 : vector<8x128xf32> to vector<1x8x128xf32>
    %cst_13 = arith.constant dense<0.000000e+00> : vector<1xf32>
    %28 = vector.multi_reduction <add>, %27, %cst_13 [1, 2] : vector<1x8x128xf32> to vector<1xf32>
    %29 = vector.shape_cast %28 : vector<1xf32> to vector<1x1x1xf32>
    %30 = vector.extract %29[0, 0, 0] : f32 from vector<1x1x1xf32>
    %31 = arith.addf %26, %30 : f32
    %c0_14 = arith.constant 0 : index
    %32 = memref.load %arg5[%c0_14] : memref<2xf32, #tpu.memory_space<smem>>
    memref.store %31, %arg5[%c0_14] : memref<2xf32, #tpu.memory_space<smem>>
    %c1 = arith.constant 1 : index
    %33 = memref.load %arg5[%c1] : memref<2xf32, #tpu.memory_space<smem>>
    %34 = vector.shape_cast %5 : vector<8x128xf32> to vector<1x8x128xf32>
    %cst_15 = arith.constant dense<0.000000e+00> : vector<1xf32>
    %35 = vector.multi_reduction <add>, %34, %cst_15 [1, 2] : vector<1x8x128xf32> to vector<1xf32>
    %36 = vector.shape_cast %35 : vector<1xf32> to vector<1x1x1xf32>
    %37 = vector.extract %36[0, 0, 0] : f32 from vector<1x1x1xf32>
    %38 = arith.addf %33, %37 : f32
    %c1_16 = arith.constant 1 : index
    %39 = memref.load %arg5[%c1_16] : memref<2xf32, #tpu.memory_space<smem>>
    memref.store %38, %arg5[%c1_16] : memref<2xf32, #tpu.memory_space<smem>>
    %c0_i32_17 = arith.constant 0 : i32
    %40 = arith.cmpi eq, %arg0, %c0_i32_17 : i32
    %41 = arith.extui %40 : i1 to i32
    %c0_i32_18 = arith.constant 0 : i32
    %42 = arith.cmpi ne, %41, %c0_i32_18 : i32
    scf.if %42 {
      %c0_19 = arith.constant 0 : index
      %43 = memref.load %arg5[%c0_19] : memref<2xf32, #tpu.memory_space<smem>>
      %c1_20 = arith.constant 1 : index
      %44 = memref.load %arg5[%c1_20] : memref<2xf32, #tpu.memory_space<smem>>
      %cst_21 = arith.constant 9.99999982E-14 : f32
      %45 = arith.addf %44, %cst_21 : f32
      %46 = arith.divf %43, %45 : f32
      %c0_22 = arith.constant 0 : index
      %c0_23 = arith.constant 0 : index
      %47 = memref.load %arg4[%c0_22, %c0_23] : memref<1x1xf32, #tpu.memory_space<smem>>
      memref.store %46, %arg4[%c0_22, %c0_23] : memref<1x1xf32, #tpu.memory_space<smem>>
    } else {
    }
    return
  }
  func.func @transform_0(%arg0: i32) -> (i32, i32) {
    %c0_i32 = arith.constant 0 : i32
    %c0_i32_0 = arith.constant 0 : i32
    return %arg0, %c0_i32 : i32, i32
  }
  func.func @transform_1(%arg0: i32) -> (i32, i32) {
    %c0_i32 = arith.constant 0 : i32
    %c0_i32_0 = arith.constant 0 : i32
    return %arg0, %c0_i32 : i32, i32
  }
  func.func @transform_2(%arg0: i32) -> (i32, i32) {
    %c0_i32 = arith.constant 0 : i32
    %c0_i32_0 = arith.constant 0 : i32
    return %arg0, %c0_i32 : i32, i32
  }
  func.func @transform_3(%arg0: i32) -> (i32, i32) {
    %c0_i32 = arith.constant 0 : i32
    %c0_i32_0 = arith.constant 0 : i32
    %c0_i32_1 = arith.constant 0 : i32
    return %c0_i32, %c0_i32_0 : i32, i32
  }
}

</mosaic_0001>

<bundles_post_ra>
// kernel: tpu_custom_call.1
= control target key start
LH: loop header
LB: loop body
LE: loop exit
PB: predicated region body
PF: predicated region fallthrough
CT: control target
= control target key end

     0   :  { %8 = vsyncpa [#allocation4], 0  ;;  %s255_s0 = inlined_call_operand.hbm [shape: f32[8,128], index: 0, kind: input, shape index: {}]   ;;  %s256_s1 = inlined_call_operand.hbm [shape: f32[8,128], index: 1, kind: input, shape index: {}]   ;;  %s257_s2 = inlined_call_operand.hbm [shape: f32[8,128], index: 2, kind: input, shape index: {}]   ;;  %s258_s3 = inlined_call_operand.hbm [shape: f32[1,1], index: 3, kind: output, shape index: {}]  }
   0x1   :  { %9 = vsyncpa [#allocation7], 0 }
   0x2   :  { %10 = vsyncpa [#allocation5], 0  ;;  %s219_s12 = smov [#allocation6]   ;;  %s220_s14 = smov [#allocation3]  }
   0x3   :  { %s27_s13 = sshll.u32 %s219_s12, 4  ;;  %s17_s15 = sshll.u32 %s220_s14, 4  ;;  %s28_s13 = int_to_ptr.vmem [resolvable:$true] %s27_s13  ;;  %s18_s15 = int_to_ptr.vmem [resolvable:$true] %s17_s15 }
   0x4   :  { %s153_s16 = scalar_lea.vmem %s28_s13, 128  ;;  %p158_p1 = scmp.lt.s32.totalorder %s28_s13, %s28_s13 }
   0x5   :  { %p154_p0 = scmp.ne.s32.totalorder %s28_s13, %s153_s16  ;;  %p159_p2 = scmp.lt.s32.totalorder %s153_s16, %s153_s16 }
   0x7   :  { %p160_p3 = por %p159_p2, %p158_p1 }
   0x9   :  { %p161_p4 = pnand %p160_p3, %p154_p0 }
   0xb   :  { %164 = shalt.err (!%p161_p4)
}
   0xc   :  { %30 = dma.hbm_to_vmem [thread:$0]  %s256_s1, 128, %s28_s13, [#allocation7]  }
   0xd   :  { %s173_s19 = scalar_lea.vmem %s18_s15, 128  ;;  %p178_p6 = scmp.lt.s32.totalorder %s18_s15, %s18_s15 }
   0xe   :  { %p174_p5 = scmp.ne.s32.totalorder %s18_s15, %s173_s19  ;;  %p179_p7 = scmp.lt.s32.totalorder %s173_s19, %s173_s19 }
  0x10   :  { %p180_p8 = por %p179_p7, %p178_p6 }
  0x12   :  { %p181_p9 = pnand %p180_p8, %p174_p5 }
  0x14   :  { %184 = shalt.err (!%p181_p9)
}
  0x15   :  { %20 = dma.hbm_to_vmem [thread:$0]  %s255_s0, 128, %s18_s15, [#allocation4]  }
  0x16   :  { %s221_s22 = smov [#allocation8]  }
  0x17   :  { %s37_s23 = sshll.u32 %s221_s22, 4  ;;  %s38_s23 = int_to_ptr.vmem [resolvable:$true] %s37_s23 }
  0x18   :  { %s193_s24 = scalar_lea.vmem %s38_s23, 128  ;;  %p198_p11 = scmp.lt.s32.totalorder %s38_s23, %s38_s23 }
  0x19   :  { %p194_p10 = scmp.ne.s32.totalorder %s38_s23, %s193_s24  ;;  %p199_p12 = scmp.lt.s32.totalorder %s193_s24, %s193_s24 }
  0x1b   :  { %p200_p13 = por %p199_p12, %p198_p11 }
  0x1d   :  { %p201_p0 = pnand %p200_p13, %p194_p10 }
  0x1f   :  { %204 = shalt.err (!%p201_p0)
}
  0x20   :  { %40 = dma.hbm_to_vmem [thread:$0]  %s257_s2, 128, %s38_s23, [#allocation7]  }
  0x21   :  { %213 = dma.done.wait [#allocation4], 128  }
  0x22   :  { %214 = vsyncadd [#allocation4], 4294967168 }
  0x23   :  { %215 = dma.done.wait [#allocation7], 256  }
  0x24   :  { %216 = vsyncadd [#allocation7], 4294967040  ;;  %v58_v0 = vld [vmem:[#allocation3] sm:$0xff]  ;;  %v59_v1 = vld [vmem:[#allocation6] sm:$0xff]  ;;  %s222_s29 = smov [#allocation9]  }
  0x25   :  { %v60_v2 = vld [vmem:[#allocation8] sm:$0xff] }
  0x26   :  { %v61_v3 = vmul.f32 %v60_v2, %v58_v0  ;;  %v62_v4 = vmul.f32 %v60_v2, %v59_v1 }
  0x28   :  { %vm63_vm0 = vcmp.eq.f32.partialorder %v62_v4, -1.0  ;;  %v64_v5 = vsub.f32 %v61_v3, %v62_v4 }
  0x2a   :  { %v65_v6 = vsel %vm63_vm0, 0.0, %v64_v5 }
  0x2b   :  { %v66_v7 = vand.u32 2147483647, %v65_v6 }
  0x2d   :  { %v68_v8 = vmul.f32 0.5, %v66_v7  ;;  %v128_v12 = vadd.f32 7.917595, %v66_v7  ;;  %vm67_vm1 = vcmp.lt.f32.partialorder %v66_v7, 10.0 }
  0x2f   :  { %v69_v9 = vadd.f32 1.0, %v68_v8 }
  0x31   :  { %141 = vlog2.f32 %v69_v9 }
  0x3e   :  { %v142_v10 = vpop.eup %141 }
  0x3f   :  { %v71_v11 = vmul.f32 0.6931472, %v142_v10 }
  0x41   :  { %v72_v13 = vmul.f32 10.0, %v71_v11 }
  0x43   :  { %v74_v14 = vsel %vm67_vm1, %v72_v13, %v128_v12 }
  0x44   :  { %76 = vadd.xlane.f32.xlu0 %v74_v14 }
  0x48   :  { %89 = vadd.xlane.f32.xlu0 %v60_v2 }
  0xcd   :  { %v77_v15 = vpop.xlane.xlu0 %76 }
  0xce   :  { %v78_v16 = vrot.slane %v77_v15, 4 }
  0xd0   :  { %v79_v17 = vadd.f32 %v78_v16, %v77_v15 }
  0xd1   :  { %v90_v18 = vpop.xlane.xlu0 %89 }
  0xd2   :  { %v80_v19 = vrot.slane %v79_v17, 2  ;;  %v91_v20 = vrot.slane %v90_v18, 4 }
  0xd4   :  { %v92_v21 = vadd.f32 %v91_v20, %v90_v18  ;;  %v81_v22 = vadd.f32 %v80_v19, %v79_v17 }
  0xd6   :  { %v93_v23 = vrot.slane %v92_v21, 2  ;;  %v82_v24 = vrot.slane %v81_v22, 1 }
  0xd8   :  { %v94_v25 = vadd.f32 %v93_v23, %v92_v21  ;;  %v83_v26 = vadd.f32 %v82_v24, %v81_v22 }
  0xda   :  { %131 = vpush %v83_v26  ;;  %v95_v27 = vrot.slane %v94_v25, 1 }
  0xdc   :  { %v96_v28 = vadd.f32 %v95_v27, %v94_v25 }
  0xde   :  { %133 = vpush %v96_v28 }
 0x10b   :  { %s132_s0 = spop %131 }
 0x10f   :  { %s134_s2 = spop %133 }
 0x110   :  { %s106_s26 = sadd.f32 1e-13, %s134_s2 }
 0x112   :  { %v107_v29 = vstv %s106_s26 }
 0x113   :  { %143 = vrcp.f32 %v107_v29 }
 0x120   :  { %v144_v30 = vpop.eup %143 }
 0x121   :  { %135 = vpush %v144_v30 }
 0x152   :  { %s136_s27 = spop %135 }
 0x153   :  { %s110_s28 = smul.f32 %s136_s27, %s132_s0 }
 0x155   :  { %112 = sst [smem:[#allocation9]] %s110_s28 }
 0x156   :  { %120 = dma.smem_to_hbm %s222_s29, 16, %s258_s3, [#allocation5]  }
 0x157   :  { %217 = dma.done.wait [#allocation5], 16  }
 0x158   :  { %218 = vsyncadd [#allocation5], 4294967280 }
 0x159   :  { %124 = sfence }
 0x15a   :  { %125 = vsyncpa [#allocation4], 1 }
 0x15b   :  { %126 = vsyncpa [#allocation7], 1 }
 0x15c   :  { %127 = vsyncpa [#allocation5], 1 }

</bundles_post_ra>
